<compile_context>
chip_gen: v7x
topology: tpu7x:2x2x1
jax: 0.10.0
libtpu: 0.0.40
codegen_flags: <defaults>
</compile_context>

<pallas_src>
import functools

import jax
import jax.numpy as jnp
from jax.experimental import pallas as pl
from jax.experimental.pallas import tpu as pltpu

_LANES = 128     # vreg lane width (minor axis)
_SUBLANES = 8    # f32 sublane count (second-minor axis)


def _round_up(x, m):
    return (x + m - 1) // m * m


def ornode_kernel(x_ref, w_ref, b_ref, o_ref, *, num_children):
    """One batch tile of the fused ORNode forward.

    x_ref : (TB, F)       batch tile of inputs
    w_ref : (F, C_pad)    all child weights stacked, C padded to 128 lanes
    b_ref : (1, C_pad)    child biases (f32), zero in padded columns
    o_ref : (1, 1, TB)    OR-gate output for this tile, written lane-dense
    """
    x = x_ref[...]
    w = w_ref[...]
    b = b_ref[...]
    # All child linear layers in one MXU matmul, f32 accumulation.
    s = jnp.dot(x, w, preferred_element_type=jnp.float32) + b     # (TB, C_pad)
    c_pad = s.shape[1]
    if num_children != c_pad:
        # Mask padded child columns to -inf so they can never win the max and
        # 0*inf NaNs from the zero pad-weights never propagate.
        col = jax.lax.broadcasted_iota(jnp.int32, s.shape, 1)
        s = jnp.where(col < num_children, s, -jnp.inf)
    # OR gate == max over children; lane-axis reduce rides the XLU, and the
    # (TB,) -> (1,1,TB) relayout makes the store/writeback lane-dense.
    m = jnp.max(s, axis=1)                                         # (TB,)
    o_ref[...] = m.reshape(o_ref.shape).astype(o_ref.dtype)


@functools.partial(jax.jit, static_argnames=("max_batch_tile",))
def ornode_forward(x, w, b, *, max_batch_tile=4096):
    """x: (B, F); w: (F, C) stacked child weights; b: (1, C) stacked biases."""
    B, F = x.shape
    Fw, C = w.shape
    assert F == Fw and b.shape == (1, C)

    x_item = jnp.dtype(x.dtype).itemsize
    w_item = jnp.dtype(w.dtype).itemsize
    # Sublane granule of the x dtype (f32: 8, bf16: 16, int8/fp8: 32).
    sub = {4: 8, 2: 16, 1: 32}.get(x_item, 8)

    # --- pack children along the 128-wide lane axis (zero pad; masked in-kernel)
    C_pad = _round_up(C, _LANES)
    w_pad = jnp.zeros((F, C_pad), dtype=w.dtype).at[:, :C].set(w)
    b_pad = jnp.zeros((1, C_pad), dtype=jnp.float32).at[:, :C].set(
        b.astype(jnp.float32))

    # --- batch tile sized against a ~24 MiB VMEM budget, *including* the
    # double-buffered resident weights/bias and the (small) output buffers.
    w_resident = 2 * (F * C_pad * w_item + _SUBLANES * C_pad * 4)
    row_bytes = 2 * (F * x_item + 4)           # x + f32 out, double-buffered
    budget = 24 * (1 << 20)
    avail = max(budget - w_resident, 2 * (1 << 20))
    tb_cap = max(sub, (avail // row_bytes) // sub * sub)
    TB = max(sub, min(max_batch_tile, tb_cap))

    # --- grid over the batch with a ragged last tile (no full-array x pad);
    # force >= 2 roughly balanced tiles for medium/large B so both v7x
    # TensorCores get work (harmless extra grid step on v5e/v6e).
    ntiles = pl.cdiv(B, TB)
    if B >= 128:
        ntiles = max(ntiles, 2)
    TB = min(TB, _round_up(pl.cdiv(B, ntiles), sub))
    ntiles = pl.cdiv(B, TB)

    vmem_need = w_resident + TB * row_bytes + (2 << 20)
    vmem_limit = int(min(56 * (1 << 20), max(vmem_need, 16 * (1 << 20))))

    cost = pl.CostEstimate(
        flops=2 * B * F * C_pad,
        transcendentals=0,
        bytes_accessed=x_item * B * F + w_item * F * C_pad
        + 4 * C_pad + 4 * ntiles * TB,
    )

    out = pl.pallas_call(
        functools.partial(ornode_kernel, num_children=C),
        out_shape=jax.ShapeDtypeStruct((ntiles, 1, TB), jnp.float32),
        grid=(ntiles,),
        in_specs=[
            pl.BlockSpec((TB, F), lambda i: (i, 0)),       # batch-tiled x
            pl.BlockSpec((F, C_pad), lambda i: (0, 0)),    # VMEM-resident W
            pl.BlockSpec((1, C_pad), lambda i: (0, 0)),    # VMEM-resident bias
        ],
        out_specs=pl.BlockSpec((1, 1, TB), lambda i: (i, 0, 0)),  # lane-dense row
        compiler_params=pltpu.CompilerParams(
            dimension_semantics=("parallel",),             # megacore / v7x 2 TCs
            vmem_limit_bytes=vmem_limit,
        ),
        cost_estimate=cost,
    )(x, w_pad, b_pad)

    # (ntiles, 1, TB) lane-dense rows -> (B, 1); garbage rows from the ragged
    # last tile are sliced off here.
    return out.reshape(ntiles * TB)[:B].reshape(B, 1)


if __name__ == "__main__":
    key = jax.random.PRNGKey(0)
    kx, kw, kb, kx2, kw2, kb2, kx3, kw3, kb3 = jax.random.split(key, 9)

    # Small case consistent with the module: 4 literal children over 32 features.
    batch, features, num_children = 8, 32, 4
    x = jax.random.normal(kx, (batch, features), dtype=jnp.float32)
    w = jax.random.normal(kw, (features, num_children), dtype=jnp.float32) * 0.1
    b = jax.random.normal(kb, (1, num_children), dtype=jnp.float32) * 0.1
    y = ornode_forward(x, w, b)
    jax.block_until_ready(y)
    y_ref = jnp.max(x @ w + b, axis=1, keepdims=True)
    assert y.shape == (batch, 1)
    assert jnp.allclose(y, y_ref, atol=1e-5, rtol=1e-5)

    # Larger non-aligned batch: exercises the ragged last tile, resident
    # weights and the >=2-tile balanced grid (v7x megacore path).
    B2, F2, C2 = 1000, 128, 5
    x2 = jax.random.normal(kx2, (B2, F2), dtype=jnp.float32)
    w2 = jax.random.normal(kw2, (F2, C2), dtype=jnp.float32) * 0.1
    b2 = jax.random.normal(kb2, (1, C2), dtype=jnp.float32) * 0.1
    y2 = ornode_forward(x2, w2, b2)
    jax.block_until_ready(y2)
    y2_ref = jnp.max(x2 @ w2 + b2, axis=1, keepdims=True)
    assert y2.shape == (B2, 1)
    assert jnp.allclose(y2, y2_ref, atol=1e-4, rtol=1e-4)

    # bf16 inputs (HBM-bound fast path on v6e/v7x); f32 accumulation in-kernel.
    B3, F3, C3 = 64, 32, 3
    x3 = jax.random.normal(kx3, (B3, F3), dtype=jnp.float32).astype(jnp.bfloat16)
    w3 = (jax.random.normal(kw3, (F3, C3), dtype=jnp.float32) * 0.1).astype(
        jnp.bfloat16)
    b3 = jax.random.normal(kb3, (1, C3), dtype=jnp.float32) * 0.1
    y3 = ornode_forward(x3, w3, b3)
    jax.block_until_ready(y3)
    y3_ref = jnp.max(
        jnp.dot(x3.astype(jnp.float32), w3.astype(jnp.float32)) + b3,
        axis=1, keepdims=True)
    assert y3.shape == (B3, 1)
    assert jnp.allclose(y3, y3_ref, atol=1e-2, rtol=1e-2)

    print("KERNEL_OK")
</pallas_src>

<mosaic_0001>
module attributes {stable_mosaic.version = 11 : i64} {
  func.func @ornode_kernel(%arg0: i32, %arg1: memref<8x32xf32, #tpu.memory_space<vmem>>, %arg2: memref<32x128xf32, #tpu.memory_space<vmem>>, %arg3: memref<1x128xf32, #tpu.memory_space<vmem>>, %arg4: memref<1x1x8xf32, #tpu.memory_space<vmem>>) attributes {dimension_semantics = [#tpu.dimension_semantics<parallel>], iteration_bounds = array<i64: 1>, scalar_prefetch = 0 : i64, scratch_operands = 0 : i64, tpu.core_type = #tpu.core_type<tc>, window_params = [{transform_indices = @transform_0, window_bounds = array<i64: 8, 32>}, {pipeline_mode = #tpu.pipeline_mode<synchronous>, transform_indices = @transform_1, window_bounds = array<i64: 32, 128>}, {pipeline_mode = #tpu.pipeline_mode<synchronous>, transform_indices = @transform_2, window_bounds = array<i64: 1, 128>}, {transform_indices = @transform_3, window_bounds = array<i64: 1, 1, 8>}]} {
    %c0 = arith.constant 0 : index
    %c0_0 = arith.constant 0 : index
    %0 = vector.load %arg1[%c0, %c0_0] : memref<8x32xf32, #tpu.memory_space<vmem>>, vector<8x32xf32>
    %c0_1 = arith.constant 0 : index
    %c0_2 = arith.constant 0 : index
    %1 = vector.load %arg2[%c0_1, %c0_2] : memref<32x128xf32, #tpu.memory_space<vmem>>, vector<32x128xf32>
    %c0_3 = arith.constant 0 : index
    %c0_4 = arith.constant 0 : index
    %2 = vector.load %arg3[%c0_3, %c0_4] : memref<1x128xf32, #tpu.memory_space<vmem>>, vector<1x128xf32>
    %cst = arith.constant dense<0.000000e+00> : vector<8x128xf32>
    %3 = tpu.matmul %0, %1, %cst {dimension_numbers = #tpu.dot_dimension_numbers<[1], [0], [0], [1], [0, 0, 1, 1], [], []>} : vector<8x32xf32>, vector<32x128xf32>, vector<8x128xf32> -> vector<8x128xf32>
    %4 = vector.broadcast %2 : vector<1x128xf32> to vector<8x128xf32>
    %5 = arith.addf %3, %4 : vector<8x128xf32>
    %6 = tpu.iota {dimensions = array<i32: 1>} : vector<8x128xi32>
    %c4_i32 = arith.constant 4 : i32
    %7 = vector.broadcast %c4_i32 : i32 to vector<8x128xi32>
    %8 = arith.cmpi slt, %6, %7 : vector<8x128xi32>
    %cst_5 = arith.constant 0xFF800000 : f32
    %9 = vector.broadcast %cst_5 : f32 to vector<8x128xf32>
    %10 = arith.select %8, %5, %9 : vector<8x128xi1>, vector<8x128xf32>
    %cst_6 = arith.constant dense<0xFF800000> : vector<8xf32>
    %11 = vector.multi_reduction <maximumf>, %10, %cst_6 [1] : vector<8x128xf32> to vector<8xf32>
    %12 = vector.shape_cast %11 : vector<8xf32> to vector<1x1x8xf32>
    %c0_7 = arith.constant 0 : index
    %c0_8 = arith.constant 0 : index
    %c0_9 = arith.constant 0 : index
    %13 = vector.load %arg4[%c0_7, %c0_8, %c0_9] : memref<1x1x8xf32, #tpu.memory_space<vmem>>, vector<1x1x8xf32>
    tpu.vector_store %arg4[%c0_7, %c0_8, %c0_9], %12 {strides = array<i32>} : memref<1x1x8xf32, #tpu.memory_space<vmem>>, vector<1x1x8xf32>,
    return
  }
  func.func @transform_0(%arg0: i32) -> (i32, i32) {
    %c0_i32 = arith.constant 0 : i32
    %c0_i32_0 = arith.constant 0 : i32
    return %arg0, %c0_i32 : i32, i32
  }
  func.func @transform_1(%arg0: i32) -> (i32, i32) {
    %c0_i32 = arith.constant 0 : i32
    %c0_i32_0 = arith.constant 0 : i32
    %c0_i32_1 = arith.constant 0 : i32
    return %c0_i32, %c0_i32_0 : i32, i32
  }
  func.func @transform_2(%arg0: i32) -> (i32, i32) {
    %c0_i32 = arith.constant 0 : i32
    %c0_i32_0 = arith.constant 0 : i32
    %c0_i32_1 = arith.constant 0 : i32
    return %c0_i32, %c0_i32_0 : i32, i32
  }
  func.func @transform_3(%arg0: i32) -> (i32, i32, i32) {
    %c0_i32 = arith.constant 0 : i32
    %c0_i32_0 = arith.constant 0 : i32
    %c0_i32_1 = arith.constant 0 : i32
    return %arg0, %c0_i32, %c0_i32_0 : i32, i32, i32
  }
}

</mosaic_0001>

<bundles_post_ra>
// kernel: ornode_forward.1
= control target key start
LH: loop header
LB: loop body
LE: loop exit
PB: predicated region body
PF: predicated region fallthrough
CT: control target
= control target key end

     0   :  { %v181_v3 = vmov 0.0|0.0   ;;  %vm182_vm0 = vmmov 0   ;;  %v183_v6 = vmov 0.0   ;;  %s235_s0 = inlined_call_operand.vmem [shape: f32[8,32], index: 0, kind: input, shape index: {}]   ;;  %s236_s1 = inlined_call_operand.vmem [shape: f32[32,128], index: 1, kind: input, shape index: {}]   ;;  %s237_s2 = inlined_call_operand.vmem [shape: f32[1,128], index: 2, kind: input, shape index: {}]   ;;  %s238_s3 = inlined_call_operand.hbm [shape: f32[1,1,8], index: 3, kind: output, shape index: {}]  }
   0x1   :  { %v16_v0 = vld [vmem:[%s236_s1] sm:$0xff]  ;;  %v17_v1 = vld [vmem:[%s236_s1 + $0x8] sm:$0xff]  ;;  %v18_v2 = vld [vmem:[%s236_s1 + $0x10] sm:$0xff]  ;;  %147 = vmatprep.subr.bf16.mxu0 %v181_v3  ;;  %144 = vmatprep.mubr.msk.f32.mxu0 %vm182_vm0, %v183_v6 }
   0x2   :  { %v148_v4 = vpack.c.bf16 %v17_v1, %v16_v0  ;;  %v19_v5 = vld [vmem:[%s236_s1 + $0x18] sm:$0xff] }
   0x3   :  { %8 = vsyncpa [#allocation3], 0  ;;  %v151_v7 = vpack.c.bf16 %v19_v5, %v18_v2  ;;  %v15_v8 = vld [vmem:[%s235_s0] sm:$0xff]  ;;  %vm27_vm1 = vcmask 261120   ;;  %v101_v9 = vlaneseq  ;;  %s184_s1 = smov [#allocation2]   ;;  %vm113_vm3 = vcmask 57344  }
   0x4   :  { %149 = vmatpush3.bf16.msra.mxu0 %v148_v4  ;;  %v129_v11 = vld [vmem:[%s237_s2] ss:$0 sm:$0xff]  ;;  %s121_s24 = sshll.u32 %s184_s1, 4  ;;  %s122_s24 = int_to_ptr.vmem [resolvable:$true] %s121_s24 }
   0x5   :  { %150 = vmatprep.subr.bf16.mxu0 %v181_v3  ;;  %v102_v10 = vand.u32 127, %v101_v9  ;;  %v109_v16 = vshrl.u32 %v101_v9, 7  ;;  %s157_s0 = scalar_lea.vmem %s122_s24, 16  ;;  %s161_s25 = scalar_lea.vmem %s122_s24, 32 }
   0x6   :  { %p158_p0 = scmp.ne.s32.totalorder %s122_s24, %s157_s0  ;;  %p162_p1 = scmp.lt.s32.totalorder %s122_s24, %s122_s24 }
   0x7   :  { %vm103_vm2 = vcmp.lt.s32.totalorder %v102_v10, 4  ;;  %v110_v17 = vsub.s32 %v102_v10, %v109_v16  ;;  %p163_p2 = scmp.lt.s32.totalorder %s161_s25, %s157_s0 }
   0x8   :  { %152 = vmatpush3.bf16.msra.mxu0 %v151_v7 }
   0x9   :  { %p164_p3 = por %p163_p2, %p162_p1 }
   0xb   :  { %145 = vmatmul.mubr.msk.f32.vlgmr.msra.gmra.mrb[0].mxu0 %vm27_vm1, %v15_v8  ;;  %p165_p4 = pnand %p164_p3, %p158_p0 }
  0xde   :  { %v97_v12 = vpop.f32.mrb[0].mxu0 }
  0xdf   :  { %v98_v13 = vadd.f32 %v129_v11, %v97_v12  ;;  %v146_v14 = vpop.f32.mrb[1].mxu0 }
  0xe1   :  { %v104_v15 = vsel %vm103_vm2, %v98_v13, -inf }
  0xe2   :  { %105 = vmax.xlane.f32.xlu0 %v104_v15 }
 0x16f   :  { %v106_v18 = vpop.xlane.xlu0 %105 }
 0x170   :  { %v111_v19 = vrot.slane %v106_v18, %v110_v17 }
 0x172   :  { %114 = vst.msk [vmem:[#allocation2] sm:$0x1] %vm113_vm3, %v111_v19 }
 0x173   :  { %168 = shalt.err (!%p165_p4)
}
 0x174   :  { %s169_s27 = scalar_lea.hbm %s238_s3, 16 }
 0x175   :  { %p170_p5 = scmp.ne.s32.totalorder %s238_s3, %s169_s27  ;;  %p173_p6 = scmp.lt.u32.totalorder %s169_s27, %s238_s3 }
 0x177   :  { %p175_p7 = pnand %p173_p6, %p170_p5 }
 0x179   :  { %178 = shalt.err (!%p175_p7)
}
 0x17a   :  { %124 = dma.vmem_to_hbm [thread:$0]  %s122_s24, 16, %s238_s3, [#allocation3]  }
 0x17b   :  { %179 = dma.done.wait [#allocation3], 16  }
 0x17c   :  { %180 = vsyncadd [#allocation3], 4294967280 }
 0x17d   :  { %128 = vsyncpa [#allocation3], 1 }

</bundles_post_ra>
